<compile_context>
chip_gen: v6e
topology: v6e:2x2x1
jax: 0.10.0
libtpu: 0.0.40
codegen_flags: <defaults>
</compile_context>

<pallas_src>
import jax
import jax.numpy as jnp
from jax.experimental import pallas as pl
from jax.experimental.pallas import tpu as pltpu

# (in, out) dims of each Linear: encoder 300-200-100-50-6, decoder mirrored.
LAYER_DIMS = [(300, 200), (200, 100), (100, 50), (50, 6),
              (6, 50), (50, 100), (100, 200), (200, 300)]
N_LAYERS = len(LAYER_DIMS)


def _rup(n, m):
    return ((n + m - 1) // m) * m


# ---- Packed-slab layout (all offsets/sizes multiples of 128) ---------------
# Slab is W_ROWS x W_COLS bf16. Placement of each layer's padded (K, N) block:
#   L0 (384x256) : rows    0: 384, cols   0:256
#   L2 (128x128) : rows  384: 512, cols   0:128   | L3 (128x128) cols 128:256
#   L4 (128x128) : rows  512: 640, cols   0:128   | L5 (128x128) cols 128:256
#   L6 (128x256) : rows  640: 768, cols   0:256
#   L7a= W7[:, :256]   (256x256): rows  768:1024, cols 0:256
#   L7b= W7[:,256:384] (256x128): rows 1024:1280, cols 0:128
#   L1 (256x128) : rows 1024:1280, cols 128:256   (rides beside L7b)
W_COLS = 256
W_ROWS = 1280
W_PLACE = {
    0:    (0,    0,   384, 256),
    1:    (1024, 128, 256, 128),
    2:    (384,  0,   128, 128),
    3:    (384,  128, 128, 128),
    4:    (512,  0,   128, 128),
    5:    (512,  128, 128, 128),
    6:    (640,  0,   128, 256),
    "7a": (768,  0,   256, 256),
    "7b": (1024, 0,   256, 128),
}

X_PAD = 384      # 300 -> 384 input features
ENC_PAD = 128    # 6   -> 128 encoded lanes
DEC_PAD = 384    # 300 -> 384 decoded lanes
B_COLS = 384     # bias slab width (layer 7 bias needs 300 -> 384)


def ae_kernel(x_ref, w_ref, b_ref, enc_ref, dec_ref):
    # x_ref: (tb, 384) bf16 batch tile (features zero-padded 300->384)
    # w_ref: (1280, 256) bf16 packed weight slab
    # b_ref: (8, 384) f32 zero-padded biases (one row per layer)
    h = x_ref[...]                                            # bf16 activations

    # Encoder: layers 0..3 (layer 3 = bottleneck head, no ReLU).
    for i in range(4):
        r0, c0, kp, npad = W_PLACE[i]
        y = jnp.dot(h, w_ref[r0:r0 + kp, c0:c0 + npad],
                    preferred_element_type=jnp.float32) + b_ref[i:i + 1, 0:npad]
        if i == 3:
            enc_ref[...] = y                                  # f32 head, no ReLU
        else:
            y = jnp.maximum(y, 0.0)                           # f32 ReLU on VPU
        h = y.astype(jnp.bfloat16)

    # Decoder hidden layers 4..6 (ReLU).
    for i in range(4, 7):
        r0, c0, kp, npad = W_PLACE[i]
        y = jnp.dot(h, w_ref[r0:r0 + kp, c0:c0 + npad],
                    preferred_element_type=jnp.float32) + b_ref[i:i + 1, 0:npad]
        h = jnp.maximum(y, 0.0).astype(jnp.bfloat16)

    # Decoder head (layer 7, 200->300, no ReLU): weight is wider than the
    # 256-col slab, so it is stored as two vertically stacked column halves.
    r0, c0, kp, npad = W_PLACE["7a"]
    ya = jnp.dot(h, w_ref[r0:r0 + kp, c0:c0 + npad],
                 preferred_element_type=jnp.float32) + b_ref[7:8, 0:256]
    r0, c0, kp, npad = W_PLACE["7b"]
    yb = jnp.dot(h, w_ref[r0:r0 + kp, c0:c0 + npad],
                 preferred_element_type=jnp.float32) + b_ref[7:8, 256:384]
    dec_ref[:, 0:256] = ya
    dec_ref[:, 256:384] = yb


def pack_params(params):
    """Pack [w1, b1, ..., w8, b8] (weights (in,out), biases (1,out)) into one
    bf16 weight slab (1280x256) and one f32 bias slab (8x384)."""
    w_pack = jnp.zeros((W_ROWS, W_COLS), jnp.bfloat16)
    b_pack = jnp.zeros((N_LAYERS, B_COLS), jnp.float32)
    for i, (din, dout) in enumerate(LAYER_DIMS):
        w = params[2 * i].astype(jnp.bfloat16)
        b = params[2 * i + 1].reshape(-1).astype(jnp.float32)
        b_pack = b_pack.at[i, :dout].set(b)
        if i == 7:
            r0, c0, _, _ = W_PLACE["7a"]
            w_pack = w_pack.at[r0:r0 + din, c0:c0 + 256].set(w[:, :256])
            r0, c0, _, _ = W_PLACE["7b"]
            w_pack = w_pack.at[r0:r0 + din, c0:c0 + (dout - 256)].set(w[:, 256:])
        else:
            r0, c0, _, _ = W_PLACE[i]
            w_pack = w_pack.at[r0:r0 + din, c0:c0 + dout].set(w)
    return w_pack, b_pack


def _pick_tb(B, tb_max):
    """Batch tile: multiple of 16 (bf16 sublane packing); for medium/large
    batches ensure >= 2 grid steps so v7x's two TensorCores both get work."""
    bp16 = _rup(B, 16)
    if bp16 <= 16:
        return 16
    half = _rup((bp16 + 1) // 2, 16)
    return max(16, min(tb_max, half, 512))


def ae_forward(x, w_pack, b_pack, *, tb=256):
    """x: (B, 300) f32. Returns (encoded (B, 6), decoded (B, 300)) in f32."""
    B, D = x.shape
    assert D == LAYER_DIMS[0][0]
    tb = _pick_tb(B, tb)
    bp = _rup(B, tb)
    x_pad = jnp.zeros((bp, X_PAD), jnp.bfloat16).at[:B, :D].set(
        x.astype(jnp.bfloat16))

    flops = 2 * bp * sum(k * n for k, n in LAYER_DIMS)
    bytes_accessed = (w_pack.size * 2 + b_pack.size * 4      # bf16 slab + f32 bias
                      + bp * X_PAD * 2                       # bf16 input tile stream
                      + bp * (ENC_PAD + DEC_PAD) * 4)        # f32 outputs
    cost = pl.CostEstimate(flops=flops, transcendentals=0,
                           bytes_accessed=bytes_accessed)

    enc_pad, dec_pad = pl.pallas_call(
        ae_kernel,
        out_shape=(
            jax.ShapeDtypeStruct((bp, ENC_PAD), jnp.float32),
            jax.ShapeDtypeStruct((bp, DEC_PAD), jnp.float32),
        ),
        grid_spec=pltpu.PrefetchScalarGridSpec(
            num_scalar_prefetch=0,
            grid=(bp // tb,),
            in_specs=[
                pl.BlockSpec((tb, X_PAD), lambda i: (i, 0)),
                # Constant block index => packed weights/biases are DMA'd once
                # and stay resident in VMEM across all batch-grid steps.
                pl.BlockSpec((W_ROWS, W_COLS), lambda i: (0, 0)),
                pl.BlockSpec((N_LAYERS, B_COLS), lambda i: (0, 0)),
            ],
            out_specs=(
                pl.BlockSpec((tb, ENC_PAD), lambda i: (i, 0)),
                pl.BlockSpec((tb, DEC_PAD), lambda i: (i, 0)),
            ),
        ),
        compiler_params=pltpu.CompilerParams(
            dimension_semantics=("parallel",)),
        cost_estimate=cost,
    )(x_pad, w_pack, b_pack)
    return enc_pad[:B, :LAYER_DIMS[3][1]], dec_pad[:B, :LAYER_DIMS[7][1]]


def init_params(key):
    """Deterministic init mimicking PyTorch Linear (uniform +/- 1/sqrt(fan_in))."""
    params = []
    for din, dout in LAYER_DIMS:
        key, kw, kb = jax.random.split(key, 3)
        bound = 1.0 / (din ** 0.5)
        w = jax.random.uniform(kw, (din, dout), jnp.float32, -bound, bound)
        b = jax.random.uniform(kb, (1, dout), jnp.float32, -bound, bound)
        params += [w, b]
    return params


def ae_forward_ref(x, params):
    """Pure-JAX reference mirroring the kernel numerics (bf16 matmul inputs,
    f32 accumulation, f32 bias/ReLU)."""
    h = x.astype(jnp.float32)
    enc = dec = None
    for i in range(N_LAYERS):
        w = params[2 * i].astype(jnp.bfloat16)
        b = params[2 * i + 1]
        y = jnp.dot(h.astype(jnp.bfloat16), w,
                    preferred_element_type=jnp.float32) + b
        if i == 3:
            enc = y
            h = y
        elif i == N_LAYERS - 1:
            dec = y
        else:
            h = jnp.maximum(y, 0.0)
    return enc, dec


if __name__ == "__main__":
    key = jax.random.PRNGKey(0)
    key, kx = jax.random.split(key)
    B = 8
    x = jax.random.normal(kx, (B, 300), dtype=jnp.float32)
    params = init_params(key)
    w_pack, b_pack = pack_params(params)

    enc, dec = jax.block_until_ready(ae_forward(x, w_pack, b_pack))

    enc_ref, dec_ref = ae_forward_ref(x, params)
    assert enc.shape == (B, 6) and dec.shape == (B, 300)
    assert jnp.allclose(enc, enc_ref, atol=2e-3, rtol=2e-3), \
        float(jnp.max(jnp.abs(enc - enc_ref)))
    assert jnp.allclose(dec, dec_ref, atol=2e-3, rtol=2e-3), \
        float(jnp.max(jnp.abs(dec - dec_ref)))

    print("KERNEL_OK")
</pallas_src>

<mosaic_0001>
module attributes {stable_mosaic.version = 11 : i64} {
  func.func @ae_kernel(%arg0: i32, %arg1: memref<16x384xbf16, #tpu.memory_space<vmem>>, %arg2: memref<1280x256xbf16, #tpu.memory_space<vmem>>, %arg3: memref<8x384xf32, #tpu.memory_space<vmem>>, %arg4: memref<16x128xf32, #tpu.memory_space<vmem>>, %arg5: memref<16x384xf32, #tpu.memory_space<vmem>>) attributes {dimension_semantics = [#tpu.dimension_semantics<parallel>], iteration_bounds = array<i64: 1>, scalar_prefetch = 0 : i64, scratch_operands = 0 : i64, tpu.core_type = #tpu.core_type<tc>, window_params = [{transform_indices = @transform_0, window_bounds = array<i64: 16, 384>}, {pipeline_mode = #tpu.pipeline_mode<synchronous>, transform_indices = @transform_1, window_bounds = array<i64: 1280, 256>}, {pipeline_mode = #tpu.pipeline_mode<synchronous>, transform_indices = @transform_2, window_bounds = array<i64: 8, 384>}, {transform_indices = @transform_3, window_bounds = array<i64: 16, 128>}, {transform_indices = @transform_4, window_bounds = array<i64: 16, 384>}]} {
    %c0 = arith.constant 0 : index
    %c0_0 = arith.constant 0 : index
    %0 = vector.load %arg1[%c0, %c0_0] : memref<16x384xbf16, #tpu.memory_space<vmem>>, vector<16x384xbf16>
    %c0_1 = arith.constant 0 : index
    %c0_2 = arith.constant 0 : index
    %1 = vector.load %arg2[%c0_1, %c0_2] : memref<1280x256xbf16, #tpu.memory_space<vmem>>, vector<384x256xbf16>
    %cst = arith.constant dense<0.000000e+00> : vector<16x256xf32>
    %2 = tpu.matmul %0, %1, %cst {dimension_numbers = #tpu.dot_dimension_numbers<[1], [0], [0], [1], [0, 0, 1, 1], [], []>} : vector<16x384xbf16>, vector<384x256xbf16>, vector<16x256xf32> -> vector<16x256xf32>
    %c0_3 = arith.constant 0 : index
    %c0_4 = arith.constant 0 : index
    %3 = vector.load %arg3[%c0_3, %c0_4] : memref<8x384xf32, #tpu.memory_space<vmem>>, vector<1x256xf32>
    %4 = vector.broadcast %3 : vector<1x256xf32> to vector<16x256xf32>
    %5 = arith.addf %2, %4 : vector<16x256xf32>
    %cst_5 = arith.constant 0.000000e+00 : f32
    %6 = vector.broadcast %cst_5 : f32 to vector<16x256xf32>
    %7 = arith.maximumf %5, %6 : vector<16x256xf32>
    %8 = arith.truncf %7 : vector<16x256xf32> to vector<16x256xbf16>
    %c1024 = arith.constant 1024 : index
    %c128 = arith.constant 128 : index
    %9 = vector.load %arg2[%c1024, %c128] : memref<1280x256xbf16, #tpu.memory_space<vmem>>, vector<256x128xbf16>
    %cst_6 = arith.constant dense<0.000000e+00> : vector<16x128xf32>
    %10 = tpu.matmul %8, %9, %cst_6 {dimension_numbers = #tpu.dot_dimension_numbers<[1], [0], [0], [1], [0, 0, 1, 1], [], []>} : vector<16x256xbf16>, vector<256x128xbf16>, vector<16x128xf32> -> vector<16x128xf32>
    %c1 = arith.constant 1 : index
    %c0_7 = arith.constant 0 : index
    %11 = vector.load %arg3[%c1, %c0_7] : memref<8x384xf32, #tpu.memory_space<vmem>>, vector<1x128xf32>
    %12 = vector.broadcast %11 : vector<1x128xf32> to vector<16x128xf32>
    %13 = arith.addf %10, %12 : vector<16x128xf32>
    %cst_8 = arith.constant 0.000000e+00 : f32
    %14 = vector.broadcast %cst_8 : f32 to vector<16x128xf32>
    %15 = arith.maximumf %13, %14 : vector<16x128xf32>
    %16 = arith.truncf %15 : vector<16x128xf32> to vector<16x128xbf16>
    %c384 = arith.constant 384 : index
    %c0_9 = arith.constant 0 : index
    %17 = vector.load %arg2[%c384, %c0_9] : memref<1280x256xbf16, #tpu.memory_space<vmem>>, vector<128x128xbf16>
    %cst_10 = arith.constant dense<0.000000e+00> : vector<16x128xf32>
    %18 = tpu.matmul %16, %17, %cst_10 {dimension_numbers = #tpu.dot_dimension_numbers<[1], [0], [0], [1], [0, 0, 1, 1], [], []>} : vector<16x128xbf16>, vector<128x128xbf16>, vector<16x128xf32> -> vector<16x128xf32>
    %c2 = arith.constant 2 : index
    %c0_11 = arith.constant 0 : index
    %19 = vector.load %arg3[%c2, %c0_11] : memref<8x384xf32, #tpu.memory_space<vmem>>, vector<1x128xf32>
    %20 = vector.broadcast %19 : vector<1x128xf32> to vector<16x128xf32>
    %21 = arith.addf %18, %20 : vector<16x128xf32>
    %cst_12 = arith.constant 0.000000e+00 : f32
    %22 = vector.broadcast %cst_12 : f32 to vector<16x128xf32>
    %23 = arith.maximumf %21, %22 : vector<16x128xf32>
    %24 = arith.truncf %23 : vector<16x128xf32> to vector<16x128xbf16>
    %c384_13 = arith.constant 384 : index
    %c128_14 = arith.constant 128 : index
    %25 = vector.load %arg2[%c384_13, %c128_14] : memref<1280x256xbf16, #tpu.memory_space<vmem>>, vector<128x128xbf16>
    %cst_15 = arith.constant dense<0.000000e+00> : vector<16x128xf32>
    %26 = tpu.matmul %24, %25, %cst_15 {dimension_numbers = #tpu.dot_dimension_numbers<[1], [0], [0], [1], [0, 0, 1, 1], [], []>} : vector<16x128xbf16>, vector<128x128xbf16>, vector<16x128xf32> -> vector<16x128xf32>
    %c3 = arith.constant 3 : index
    %c0_16 = arith.constant 0 : index
    %27 = vector.load %arg3[%c3, %c0_16] : memref<8x384xf32, #tpu.memory_space<vmem>>, vector<1x128xf32>
    %28 = vector.broadcast %27 : vector<1x128xf32> to vector<16x128xf32>
    %29 = arith.addf %26, %28 : vector<16x128xf32>
    %c0_17 = arith.constant 0 : index
    %c0_18 = arith.constant 0 : index
    %30 = vector.load %arg4[%c0_17, %c0_18] : memref<16x128xf32, #tpu.memory_space<vmem>>, vector<16x128xf32>
    tpu.vector_store %arg4[%c0_17, %c0_18], %29 {strides = array<i32>} : memref<16x128xf32, #tpu.memory_space<vmem>>, vector<16x128xf32>,
    %31 = arith.truncf %29 : vector<16x128xf32> to vector<16x128xbf16>
    %c512 = arith.constant 512 : index
    %c0_19 = arith.constant 0 : index
    %32 = vector.load %arg2[%c512, %c0_19] : memref<1280x256xbf16, #tpu.memory_space<vmem>>, vector<128x128xbf16>
    %cst_20 = arith.constant dense<0.000000e+00> : vector<16x128xf32>
    %33 = tpu.matmul %31, %32, %cst_20 {dimension_numbers = #tpu.dot_dimension_numbers<[1], [0], [0], [1], [0, 0, 1, 1], [], []>} : vector<16x128xbf16>, vector<128x128xbf16>, vector<16x128xf32> -> vector<16x128xf32>
    %c4 = arith.constant 4 : index
    %c0_21 = arith.constant 0 : index
    %34 = vector.load %arg3[%c4, %c0_21] : memref<8x384xf32, #tpu.memory_space<vmem>>, vector<1x128xf32>
    %35 = vector.broadcast %34 : vector<1x128xf32> to vector<16x128xf32>
    %36 = arith.addf %33, %35 : vector<16x128xf32>
    %cst_22 = arith.constant 0.000000e+00 : f32
    %37 = vector.broadcast %cst_22 : f32 to vector<16x128xf32>
    %38 = arith.maximumf %36, %37 : vector<16x128xf32>
    %39 = arith.truncf %38 : vector<16x128xf32> to vector<16x128xbf16>
    %c512_23 = arith.constant 512 : index
    %c128_24 = arith.constant 128 : index
    %40 = vector.load %arg2[%c512_23, %c128_24] : memref<1280x256xbf16, #tpu.memory_space<vmem>>, vector<128x128xbf16>
    %cst_25 = arith.constant dense<0.000000e+00> : vector<16x128xf32>
    %41 = tpu.matmul %39, %40, %cst_25 {dimension_numbers = #tpu.dot_dimension_numbers<[1], [0], [0], [1], [0, 0, 1, 1], [], []>} : vector<16x128xbf16>, vector<128x128xbf16>, vector<16x128xf32> -> vector<16x128xf32>
    %c5 = arith.constant 5 : index
    %c0_26 = arith.constant 0 : index
    %42 = vector.load %arg3[%c5, %c0_26] : memref<8x384xf32, #tpu.memory_space<vmem>>, vector<1x128xf32>
    %43 = vector.broadcast %42 : vector<1x128xf32> to vector<16x128xf32>
    %44 = arith.addf %41, %43 : vector<16x128xf32>
    %cst_27 = arith.constant 0.000000e+00 : f32
    %45 = vector.broadcast %cst_27 : f32 to vector<16x128xf32>
    %46 = arith.maximumf %44, %45 : vector<16x128xf32>
    %47 = arith.truncf %46 : vector<16x128xf32> to vector<16x128xbf16>
    %c640 = arith.constant 640 : index
    %c0_28 = arith.constant 0 : index
    %48 = vector.load %arg2[%c640, %c0_28] : memref<1280x256xbf16, #tpu.memory_space<vmem>>, vector<128x256xbf16>
    %cst_29 = arith.constant dense<0.000000e+00> : vector<16x256xf32>
    %49 = tpu.matmul %47, %48, %cst_29 {dimension_numbers = #tpu.dot_dimension_numbers<[1], [0], [0], [1], [0, 0, 1, 1], [], []>} : vector<16x128xbf16>, vector<128x256xbf16>, vector<16x256xf32> -> vector<16x256xf32>
    %c6 = arith.constant 6 : index
    %c0_30 = arith.constant 0 : index
    %50 = vector.load %arg3[%c6, %c0_30] : memref<8x384xf32, #tpu.memory_space<vmem>>, vector<1x256xf32>
    %51 = vector.broadcast %50 : vector<1x256xf32> to vector<16x256xf32>
    %52 = arith.addf %49, %51 : vector<16x256xf32>
    %cst_31 = arith.constant 0.000000e+00 : f32
    %53 = vector.broadcast %cst_31 : f32 to vector<16x256xf32>
    %54 = arith.maximumf %52, %53 : vector<16x256xf32>
    %55 = arith.truncf %54 : vector<16x256xf32> to vector<16x256xbf16>
    %c768 = arith.constant 768 : index
    %c0_32 = arith.constant 0 : index
    %56 = vector.load %arg2[%c768, %c0_32] : memref<1280x256xbf16, #tpu.memory_space<vmem>>, vector<256x256xbf16>
    %cst_33 = arith.constant dense<0.000000e+00> : vector<16x256xf32>
    %57 = tpu.matmul %55, %56, %cst_33 {dimension_numbers = #tpu.dot_dimension_numbers<[1], [0], [0], [1], [0, 0, 1, 1], [], []>} : vector<16x256xbf16>, vector<256x256xbf16>, vector<16x256xf32> -> vector<16x256xf32>
    %c7 = arith.constant 7 : index
    %c0_34 = arith.constant 0 : index
    %58 = vector.load %arg3[%c7, %c0_34] : memref<8x384xf32, #tpu.memory_space<vmem>>, vector<1x256xf32>
    %59 = vector.broadcast %58 : vector<1x256xf32> to vector<16x256xf32>
    %60 = arith.addf %57, %59 : vector<16x256xf32>
    %c1024_35 = arith.constant 1024 : index
    %c0_36 = arith.constant 0 : index
    %61 = vector.load %arg2[%c1024_35, %c0_36] : memref<1280x256xbf16, #tpu.memory_space<vmem>>, vector<256x128xbf16>
    %cst_37 = arith.constant dense<0.000000e+00> : vector<16x128xf32>
    %62 = tpu.matmul %55, %61, %cst_37 {dimension_numbers = #tpu.dot_dimension_numbers<[1], [0], [0], [1], [0, 0, 1, 1], [], []>} : vector<16x256xbf16>, vector<256x128xbf16>, vector<16x128xf32> -> vector<16x128xf32>
    %c7_38 = arith.constant 7 : index
    %c256 = arith.constant 256 : index
    %63 = vector.load %arg3[%c7_38, %c256] : memref<8x384xf32, #tpu.memory_space<vmem>>, vector<1x128xf32>
    %64 = vector.broadcast %63 : vector<1x128xf32> to vector<16x128xf32>
    %65 = arith.addf %62, %64 : vector<16x128xf32>
    %c0_39 = arith.constant 0 : index
    %c0_40 = arith.constant 0 : index
    %66 = vector.load %arg5[%c0_39, %c0_40] : memref<16x384xf32, #tpu.memory_space<vmem>>, vector<16x256xf32>
    tpu.vector_store %arg5[%c0_39, %c0_40], %60 {strides = array<i32>} : memref<16x384xf32, #tpu.memory_space<vmem>>, vector<16x256xf32>,
    %c0_41 = arith.constant 0 : index
    %c256_42 = arith.constant 256 : index
    %67 = vector.load %arg5[%c0_41, %c256_42] : memref<16x384xf32, #tpu.memory_space<vmem>>, vector<16x128xf32>
    tpu.vector_store %arg5[%c0_41, %c256_42], %65 {strides = array<i32>} : memref<16x384xf32, #tpu.memory_space<vmem>>, vector<16x128xf32>,
    return
  }
  func.func @transform_0(%arg0: i32) -> (i32, i32) {
    %c0_i32 = arith.constant 0 : i32
    %c0_i32_0 = arith.constant 0 : i32
    return %arg0, %c0_i32 : i32, i32
  }
  func.func @transform_1(%arg0: i32) -> (i32, i32) {
    %c0_i32 = arith.constant 0 : i32
    %c0_i32_0 = arith.constant 0 : i32
    %c0_i32_1 = arith.constant 0 : i32
    return %c0_i32, %c0_i32_0 : i32, i32
  }
  func.func @transform_2(%arg0: i32) -> (i32, i32) {
    %c0_i32 = arith.constant 0 : i32
    %c0_i32_0 = arith.constant 0 : i32
    %c0_i32_1 = arith.constant 0 : i32
    return %c0_i32, %c0_i32_0 : i32, i32
  }
  func.func @transform_3(%arg0: i32) -> (i32, i32) {
    %c0_i32 = arith.constant 0 : i32
    %c0_i32_0 = arith.constant 0 : i32
    return %arg0, %c0_i32 : i32, i32
  }
  func.func @transform_4(%arg0: i32) -> (i32, i32) {
    %c0_i32 = arith.constant 0 : i32
    %c0_i32_0 = arith.constant 0 : i32
    return %arg0, %c0_i32 : i32, i32
  }
}

</mosaic_0001>

<bundles_post_ra>
// kernel: tpu_custom_call.1
= control target key start
LH: loop header
LB: loop body
LE: loop exit
PB: predicated region body
PF: predicated region fallthrough
CT: control target
= control target key end

     0   :  { %10 = vsyncpa [#allocation3], 0  ;;  %s2464_s0 = inlined_call_operand.hbm [shape: bf16[16,384], index: 0, kind: input, shape index: {}]   ;;  %s2465_s1 = inlined_call_operand.hbm [shape: bf16[1280,256], index: 1, kind: input, shape index: {}]   ;;  %s2466_s2 = inlined_call_operand.hbm [shape: f32[8,384], index: 2, kind: input, shape index: {}]   ;;  %s2467_s3 = inlined_call_operand.hbm [shape: f32[16,128], index: 3, kind: output, shape index: {0}]   ;;  %s2468_s4 = inlined_call_operand.hbm [shape: f32[16,384], index: 4, kind: output, shape index: {1}]  }
   0x1   :  { %11 = vsyncpa [#allocation6], 0 }
   0x2   :  { %12 = vsyncpa [#allocation4], 0 }
   0x3   :  { %13 = vsyncpa [#allocation10], 0  ;;  %s2352_s15 = smov [#allocation5]  }
   0x4   :  { %s31_s16 = sshll.u32 %s2352_s15, 4  ;;  %s32_s16 = int_to_ptr.vmem [resolvable:$true] %s31_s16 }
   0x5   :  { %s2252_s17 = scalar_lea.vmem %s32_s16, 20480  ;;  %p2257_p1 = scmp.lt.s32.totalorder %s32_s16, %s32_s16 }
   0x6   :  { %p2253_p0 = scmp.ne.s32.totalorder %s32_s16, %s2252_s17  ;;  %p2258_p2 = scmp.lt.s32.totalorder %s2252_s17, %s2252_s17 }
   0x8   :  { %p2259_p3 = por %p2258_p2, %p2257_p1 }
   0xa   :  { %p2260_p4 = pnand %p2259_p3, %p2253_p0 }
   0xc   :  { %2263 = shalt.err (!%p2260_p4)
}
   0xd   :  { %s2353_s18 = smov 128   ;;  %s2354_s19 = smov 8  }
   0xe   :  { %37 = dma.hbm_to_vmem [thread:$0]  %s2465_s1, 20480, %s32_s16, [#allocation6], %s2353_s18, %s2353_s18, %s2354_s19  }
   0xf   :  { %s2355_s22 = smov [#allocation2]  }
  0x10   :  { %s19_s23 = sshll.u32 %s2355_s22, 4  ;;  %s20_s23 = int_to_ptr.vmem [resolvable:$true] %s19_s23 }
  0x11   :  { %s2272_s24 = scalar_lea.vmem %s20_s23, 384  ;;  %p2277_p6 = scmp.lt.s32.totalorder %s20_s23, %s20_s23 }
  0x12   :  { %p2273_p5 = scmp.ne.s32.totalorder %s20_s23, %s2272_s24  ;;  %p2278_p7 = scmp.lt.s32.totalorder %s2272_s24, %s2272_s24 }
  0x14   :  { %p2279_p8 = por %p2278_p7, %p2277_p6 }
  0x16   :  { %p2280_p9 = pnand %p2279_p8, %p2273_p5 }
  0x18   :  { %2283 = shalt.err (!%p2280_p9)
}
  0x19   :  { %s2356_s25 = smov 192   ;;  %s2357_s26 = smov 12  }
  0x1a   :  { %25 = dma.hbm_to_vmem [thread:$0]  %s2464_s0, 384, %s20_s23, [#allocation3], %s2356_s25, %s2356_s25, %s2357_s26  }
  0x1b   :  { %s2358_s29 = smov [#allocation7]  }
  0x1c   :  { %s44_s30 = sshll.u32 %s2358_s29, 4  ;;  %s45_s30 = int_to_ptr.vmem [resolvable:$true] %s44_s30 }
  0x1d   :  { %s2292_s1 = scalar_lea.vmem %s45_s30, 384  ;;  %p2297_p11 = scmp.lt.s32.totalorder %s45_s30, %s45_s30 }
  0x1e   :  { %p2293_p10 = scmp.ne.s32.totalorder %s45_s30, %s2292_s1  ;;  %p2298_p12 = scmp.lt.s32.totalorder %s2292_s1, %s2292_s1 }
  0x20   :  { %p2299_p13 = por %p2298_p12, %p2297_p11 }
  0x22   :  { %p2300_p0 = pnand %p2299_p13, %p2293_p10 }
  0x24   :  { %2303 = shalt.err (!%p2300_p0)
}
  0x25   :  { %47 = dma.hbm_to_vmem [thread:$0]  %s2466_s2, 384, %s45_s30, [#allocation6]  }
  0x26   :  { %2344 = dma.done.wait [#allocation3], 384  }
  0x27   :  { %2345 = vsyncadd [#allocation3], 4294966912 }
  0x28   :  { %2346 = dma.done.wait [#allocation6], 20864  }
  0x29   :  { %2347 = vsyncadd [#allocation6], 4294946432  ;;  %v2359_v0 = vmov 0   ;;  %v2032_v1 = vld [vmem:[#allocation5 + $0x74] ss:$8 sps:$4 sm:$0xff]   ;;  %vm2361_vm0 = vmmov 0  }
  0x2a   :  { %453 = vmatprep.mubr.bf16.mxu1 %v2359_v0  ;;  %v2034_v2 = vld [vmem:[#allocation5 + $0x70] ss:$8 sps:$4 sm:$0xff]   ;;  %378 = vmatprep.subr.bf16.mxu0 %v2032_v1  ;;  %v2035_v3 = vld [vmem:[#allocation5 + $0x64] ss:$8 sps:$4 sm:$0xff]   ;;  %v2037_v4 = vld [vmem:[#allocation5 + $0x60] ss:$8 sps:$4 sm:$0xff]  }
  0x2b   :  { %379 = vmatpush1.bf16.msra.mxu0 %v2034_v2  ;;  %v2038_v5 = vld [vmem:[#allocation5 + $0x54] ss:$8 sps:$4 sm:$0xff]   ;;  %v2040_v6 = vld [vmem:[#allocation5 + $0x50] ss:$8 sps:$4 sm:$0xff]   ;;  %v2041_v7 = vld [vmem:[#allocation5 + $0x44] ss:$8 sps:$4 sm:$0xff]  }
  0x2c   :  { %380 = vmatprep.subr.bf16.mxu0 %v2035_v3  ;;  %v2043_v8 = vld [vmem:[#allocation5 + $0x40] ss:$8 sps:$4 sm:$0xff]   ;;  %v2055_v9 = vld [vmem:[#allocation5 + $0x174] ss:$8 sps:$4 sm:$0xff]   ;;  %v2058_v10 = vld [vmem:[#allocation5 + $0x170] ss:$8 sps:$4 sm:$0xff]  }
  0x2d   :  { %v2044_v11 = vld [vmem:[#allocation5 + $0x34] ss:$8 sps:$4 sm:$0xff]   ;;  %421 = vmatprep.subr.bf16.mxu1 %v2055_v9  ;;  %v2061_v12 = vld [vmem:[#allocation5 + $0x164] ss:$8 sps:$4 sm:$0xff]   ;;  %v2064_v13 = vld [vmem:[#allocation5 + $0x160] ss:$8 sps:$4 sm:$0xff]  }
  0x2e   :  { %422 = vmatpush1.bf16.msra.mxu1 %v2058_v10  ;;  %v2046_v14 = vld [vmem:[#allocation5 + $0x30] ss:$8 sps:$4 sm:$0xff]   ;;  %v2047_v15 = vld [vmem:[#allocation5 + $0x24] ss:$8 sps:$4 sm:$0xff]   ;;  %v2067_v16 = vld [vmem:[#allocation5 + $0x154] ss:$8 sps:$4 sm:$0xff]   ;;  %v112_v10 = vlaneseq }
  0x2f   :  { %381 = vmatpush1.bf16.msra.mxu0 %v2037_v4  ;;  %423 = vmatprep.subr.bf16.mxu1 %v2061_v12  ;;  %v2070_v17 = vld [vmem:[#allocation5 + $0x150] ss:$8 sps:$4 sm:$0xff]   ;;  %v2049_v18 = vld [vmem:[#allocation5 + $0x20] ss:$8 sps:$4 sm:$0xff]   ;;  %v2073_v19 = vld [vmem:[#allocation5 + $0x144] ss:$8 sps:$4 sm:$0xff]  }
  0x30   :  { %382 = vmatprep.subr.bf16.mxu0 %v2038_v5  ;;  %v2050_v20 = vld [vmem:[#allocation5 + $0x14] ss:$8 sps:$4 sm:$0xff]   ;;  %v2052_v21 = vld [vmem:[#allocation5 + $0x10] ss:$8 sps:$4 sm:$0xff]   ;;  %v2076_v22 = vld [vmem:[#allocation5 + $0x140] ss:$8 sps:$4 sm:$0xff]  }
  0x31   :  { %v2079_v23 = vld [vmem:[#allocation5 + $0x134] ss:$8 sps:$4 sm:$0xff]   ;;  %v2053_v24 = vld [vmem:[#allocation5 + $0x4] ss:$8 sps:$4 sm:$0xff]   ;;  %v2082_v25 = vld [vmem:[#allocation5 + $0x130] ss:$8 sps:$4 sm:$0xff]  }
  0x32   :  { %424 = vmatpush1.bf16.msra.mxu1 %v2064_v13  ;;  %v2057_v26 = vld [vmem:[#allocation5] ss:$8 sps:$4 sm:$0xff]   ;;  %v2085_v27 = vld [vmem:[#allocation5 + $0x124] ss:$8 sps:$4 sm:$0xff]   ;;  %v2059_v28 = vld [vmem:[#allocation5 + $0xf4] ss:$8 sps:$4 sm:$0xff]  }
  0x33   :  { %383 = vmatpush1.bf16.msra.mxu0 %v2040_v6  ;;  %425 = vmatprep.subr.bf16.mxu1 %v2067_v16  ;;  %v2063_v29 = vld [vmem:[#allocation5 + $0xf0] ss:$8 sps:$4 sm:$0xff]   ;;  %v2088_v30 = vld [vmem:[#allocation5 + $0x120] ss:$8 sps:$4 sm:$0xff]   ;;  %v2091_v31 = vld [vmem:[#allocation5 + $0x114] ss:$8 sps:$4 sm:$0xff]  }
  0x34   :  { %384 = vmatprep.subr.bf16.mxu0 %v2041_v7  ;;  %v2065_v32 = vld [vmem:[#allocation5 + $0xe4] ss:$8 sps:$4 sm:$0xff]   ;;  %v2069_v33 = vld [vmem:[#allocation5 + $0xe0] ss:$8 sps:$4 sm:$0xff]   ;;  %v2094_v34 = vld [vmem:[#allocation5 + $0x110] ss:$8 sps:$4 sm:$0xff]  }
  0x35   :  { %v2107_v35 = vld [vmem:[#allocation2 + $0x4] ss:$12 sps:$4 sm:$0xff]   ;;  %v2071_v37 = vld [vmem:[#allocation5 + $0xd4] ss:$8 sps:$4 sm:$0xff]   ;;  %v2100_v40 = vld [vmem:[#allocation5 + $0x100] ss:$8 sps:$4 sm:$0xff]  }
  0x36   :  { %426 = vmatpush1.bf16.msra.mxu1 %v2070_v17  ;;  %v2097_v36 = vld [vmem:[#allocation5 + $0x104] ss:$8 sps:$4 sm:$0xff]   ;;  %410 = vmatprep.mubr.bf16.mxu0 %v2107_v35  ;;  %v2075_v38 = vld [vmem:[#allocation5 + $0xd0] ss:$8 sps:$4 sm:$0xff]   ;;  %v2108_v42 = vld [vmem:[#allocation5 + $0x4f4] ss:$8 sps:$4 sm:$0xff]  }
  0x37   :  { %385 = vmatpush1.bf16.msra.mxu0 %v2043_v8  ;;  %427 = vmatprep.subr.bf16.mxu1 %v2073_v19  ;;  %v2077_v39 = vld [vmem:[#allocation5 + $0xc4] ss:$8 sps:$4 sm:$0xff]   ;;  %v2103_v41 = vld [vmem:[#allocation2 + $0x8] ss:$12 sps:$4 sm:$0xff]   ;;  %v2081_v44 = vld [vmem:[#allocation5 + $0xc0] ss:$8 sps:$4 sm:$0xff]  }
  0x38   :  { %386 = vmatprep.subr.bf16.mxu0 %v2044_v11  ;;  %v2109_v43 = vld [vmem:[#allocation5 + $0x474] ss:$8 sps:$4 sm:$0xff]   ;;  %v2110_v45 = vld [vmem:[#allocation5 + $0x4e4] ss:$8 sps:$4 sm:$0xff]   ;;  %v2087_v48 = vld [vmem:[#allocation5 + $0xb0] ss:$8 sps:$4 sm:$0xff]  }
  0x39   :  { %v2083_v46 = vld [vmem:[#allocation5 + $0xb4] ss:$8 sps:$4 sm:$0xff]   ;;  %v2111_v47 = vld [vmem:[#allocation5 + $0x464] ss:$8 sps:$4 sm:$0xff]   ;;  %v2093_v52 = vld [vmem:[#allocation5 + $0xa0] ss:$8 sps:$4 sm:$0xff]  }
  0x3a   :  { %428 = vmatpush1.bf16.msra.mxu1 %v2076_v22  ;;  %v2112_v49 = vld [vmem:[#allocation5 + $0x4d4] ss:$8 sps:$4 sm:$0xff]   ;;  %v2089_v50 = vld [vmem:[#allocation5 + $0xa4] ss:$8 sps:$4 sm:$0xff]   ;;  %v2099_v54 = vld [vmem:[#allocation5 + $0x90] ss:$8 sps:$4 sm:$0xff]  }
  0x3b   :  { %387 = vmatpush1.bf16.msra.mxu0 %v2046_v14  ;;  %429 = vmatprep.subr.bf16.mxu1 %v2079_v23  ;;  %v2113_v51 = vld [vmem:[#allocation5 + $0x454] ss:$8 sps:$4 sm:$0xff]   ;;  %v2101_v55 = vld [vmem:[#allocation5 + $0x84] ss:$8 sps:$4 sm:$0xff]   ;;  %v2104_v56 = vld [vmem:[#allocation5 + $0x80] ss:$8 sps:$4 sm:$0xff]  }
  0x3c   :  { %388 = vmatprep.subr.bf16.mxu0 %v2047_v15  ;;  %v2095_v53 = vld [vmem:[#allocation5 + $0x94] ss:$8 sps:$4 sm:$0xff]   ;;  %v2114_v58 = vld [vmem:[#allocation5 + $0x4c4] ss:$8 sps:$4 sm:$0xff]   ;;  %v2124_v5 = vld [vmem:[#allocation5 + $0x1f0] ss:$8 sps:$4 sm:$0xff]  }
  0x3d   :  { %v2105_v57 = vld [vmem:[#allocation2] ss:$12 sps:$4 sm:$0xff]   ;;  %v2115_v59 = vld [vmem:[#allocation5 + $0x444] ss:$8 sps:$4 sm:$0xff]   ;;  %v2360_v6 = vmov 0.0   ;;  %v113_v11 = vshrl.u32 %v112_v10, 7 }
  0x3e   :  { %430 = vmatpush1.bf16.msra.mxu1 %v2082_v25  ;;  %v2116_v60 = vld [vmem:[#allocation5 + $0x4b4] ss:$8 sps:$4 sm:$0xff]   ;;  %v2118_v62 = vld [vmem:[#allocation5 + $0x4a4] ss:$8 sps:$4 sm:$0xff]   ;;  %v2125_v7 = vld [vmem:[#allocation5 + $0x1e0] ss:$8 sps:$4 sm:$0xff]  }
  0x3f   :  { %389 = vmatpush1.bf16.msra.mxu0 %v2049_v18  ;;  %431 = vmatprep.subr.bf16.mxu1 %v2085_v27  ;;  %v2117_v61 = vld [vmem:[#allocation5 + $0x434] ss:$8 sps:$4 sm:$0xff]   ;;  %v2119_v63 = vld [vmem:[#allocation5 + $0x424] ss:$8 sps:$4 sm:$0xff]   ;;  %v2126_v8 = vld [vmem:[#allocation5 + $0x1d0] ss:$8 sps:$4 sm:$0xff]  }
  0x40   :  { %390 = vmatprep.subr.bf16.mxu0 %v2050_v20  ;;  %v2120_v1 = vld [vmem:[#allocation5 + $0x494] ss:$8 sps:$4 sm:$0xff]   ;;  %v2122_v3 = vld [vmem:[#allocation5 + $0x484] ss:$8 sps:$4 sm:$0xff]   ;;  %v2127_v9 = vld [vmem:[#allocation5 + $0x1c0] ss:$8 sps:$4 sm:$0xff]  }
  0x41   :  { %v2121_v2 = vld [vmem:[#allocation5 + $0x414] ss:$8 sps:$4 sm:$0xff]   ;;  %v2123_v4 = vld [vmem:[#allocation5 + $0x404] ss:$8 sps:$4 sm:$0xff]   ;;  %v2410_v12 = vsub.s32 1, %v113_v11  ;;  %v2412_v14 = vsub.s32 0, %v113_v11 }
  0x42   :  { %432 = vmatpush1.bf16.msra.mxu1 %v2088_v30  ;;  %v110_v15 = vld [vmem:[#allocation7] ss:$8 sm:$0x3]  ;;  %s2362_s0 = smov [#allocation8]  }
  0x43   :  { %391 = vmatpush1.bf16.msra.mxu0 %v2052_v21  ;;  %433 = vmatprep.subr.bf16.mxu1 %v2091_v31  ;;  %v119_v16 = vrot.slane %v110_v15, %v2410_v12  ;;  %v115_v18 = vrot.slane %v110_v15, %v2412_v14  ;;  %s1666_s2 = sshll.u32 %s2362_s0, 4  ;;  %s1667_s2 = int_to_ptr.vmem [resolvable:$true] %s1666_s2 }
  0x44   :  { %392 = vmatprep.subr.bf16.mxu0 %v2053_v24  ;;  %s2304_s7 = scalar_lea.vmem %s1667_s2, 256  ;;  %p2309_p2 = scmp.lt.s32.totalorder %s1667_s2, %s1667_s2 }
  0x45   :  { %p2305_p1 = scmp.ne.s32.totalorder %s1667_s2, %s2304_s7  ;;  %p2310_p3 = scmp.lt.s32.totalorder %s2304_s7, %s2304_s7 }
  0x46   :  { %434 = vmatpush1.bf16.msra.mxu1 %v2094_v34 }
  0x47   :  { %393 = vmatpush1.bf16.msra.mxu0 %v2057_v26  ;;  %435 = vmatprep.subr.bf16.mxu1 %v2097_v36  ;;  %p2311_p4 = por %p2310_p3, %p2309_p2 }
  0x48   :  { %394 = vmatprep.subr.bf16.mxu0 %v2059_v28 }
  0x49   :  { %p2312_p5 = pnand %p2311_p4, %p2305_p1 }
  0x4a   :  { %436 = vmatpush1.bf16.msra.mxu1 %v2100_v40  ;;  %v2129_v40 = vld [vmem:[#allocation5 + $0x1a0] ss:$8 sps:$4 sm:$0xff]  }
  0x4b   :  { %395 = vmatpush2.bf16.msra.mxu0 %v2063_v29  ;;  %1858 = vmatprep.subr.bf16.mxu1 %v2108_v42  ;;  %v2131_v42 = vld [vmem:[#allocation5 + $0x180] ss:$8 sps:$4 sm:$0xff]  }
  0x4c   :  { %396 = vmatprep.subr.bf16.mxu0 %v2065_v32 }
  0x4d   :  { %454 = vmatmul.mubr.bf16.vlgmr.msra.gmra.mxu1 %v2103_v41  ;;  %v2130_v41 = vld [vmem:[#allocation5 + $0x190] ss:$8 sps:$4 sm:$0xff]  }
  0x4e   :  { %1859 = vmatpush3.bf16.msra.mxu1 %v2109_v43  ;;  %v2132_v43 = vld [vmem:[#allocation5 + $0x1f4] ss:$8 sps:$4 sm:$0xff]  }
  0x4f   :  { %397 = vmatpush2.bf16.msra.mxu0 %v2069_v33  ;;  %1860 = vmatprep.subr.bf16.mxu1 %v2110_v45  ;;  %v2134_v45 = vld [vmem:[#allocation5 + $0x1d4] ss:$8 sps:$4 sm:$0xff]  }
  0x50   :  { %398 = vmatprep.subr.bf16.mxu0 %v2071_v37 }
  0x52   :  { %1861 = vmatpush3.bf16.msra.mxu1 %v2111_v47  ;;  %v2136_v47 = vld [vmem:[#allocation5 + $0x1b4] ss:$8 sps:$4 sm:$0xff]  }
  0x53   :  { %399 = vmatpush2.bf16.msra.mxu0 %v2075_v38  ;;  %1862 = vmatprep.subr.bf16.mxu1 %v2112_v49 }
  0x54   :  { %400 = vmatprep.subr.bf16.mxu0 %v2077_v39  ;;  %v2128_v39 = vld [vmem:[#allocation5 + $0x1b0] ss:$8 sps:$4 sm:$0xff]  }
  0x56   :  { %1863 = vmatpush3.bf16.msra.mxu1 %v2113_v51  ;;  %v502_v51 = vld [vmem:[#allocation7 + $0x1] ss:$0 sm:$0xff] }
  0x57   :  { %401 = vmatpush2.bf16.msra.mxu0 %v2081_v44  ;;  %1864 = vmatprep.subr.bf16.mxu1 %v2114_v58  ;;  %v2133_v44 = vld [vmem:[#allocation5 + $0x1e4] ss:$8 sps:$4 sm:$0xff]  }
  0x58   :  { %402 = vmatprep.subr.bf16.mxu0 %v2083_v46  ;;  %v2135_v46 = vld [vmem:[#allocation5 + $0x1c4] ss:$8 sps:$4 sm:$0xff]  }
  0x5a   :  { %1865 = vmatpush3.bf16.msra.mxu1 %v2115_v59 }
  0x5b   :  { %403 = vmatpush2.bf16.msra.mxu0 %v2087_v48  ;;  %1866 = vmatprep.subr.bf16.mxu1 %v2116_v60  ;;  %v2137_v60 = vld [vmem:[#allocation5 + $0x1a4] ss:$8 sps:$4 sm:$0xff]  }
  0x5c   :  { %404 = vmatprep.subr.bf16.mxu0 %v2089_v50 }
  0x5e   :  { %1867 = vmatpush3.bf16.msra.mxu1 %v2117_v61  ;;  %v2138_v61 = vld [vmem:[#allocation5 + $0x194] ss:$8 sps:$4 sm:$0xff]  }
  0x5f   :  { %405 = vmatpush2.bf16.msra.mxu0 %v2093_v52  ;;  %1868 = vmatprep.subr.bf16.mxu1 %v2118_v62  ;;  %v2139_v62 = vld [vmem:[#allocation5 + $0x184] ss:$8 sps:$4 sm:$0xff]  }
  0x60   :  { %406 = vmatprep.subr.bf16.mxu0 %v2095_v53 }
  0x62   :  { %1869 = vmatpush3.bf16.msra.mxu1 %v2119_v63  ;;  %v2140_v63 = vld [vmem:[#allocation5 + $0x270] ss:$8 sps:$4 sm:$0xff]  }
  0x63   :  { %407 = vmatpush2.bf16.msra.mxu0 %v2099_v54  ;;  %1870 = vmatprep.subr.bf16.mxu1 %v2120_v1  ;;  %v2141_v1 = vld [vmem:[#allocation5 + $0x260] ss:$8 sps:$4 sm:$0xff]  }
  0x64   :  { %408 = vmatprep.subr.bf16.mxu0 %v2101_v55 }
  0x66   :  { %1871 = vmatpush3.bf16.msra.mxu1 %v2121_v2  ;;  %v2142_v2 = vld [vmem:[#allocation5 + $0x250] ss:$8 sps:$4 sm:$0xff]  }
  0x67   :  { %409 = vmatpush2.bf16.msra.mxu0 %v2104_v56  ;;  %1872 = vmatprep.subr.bf16.mxu1 %v2122_v3  ;;  %v2143_v3 = vld [vmem:[#allocation5 + $0x240] ss:$8 sps:$4 sm:$0xff]  }
  0x68   :  { %1938 = vmatprep.subr.bf16.mxu0 %v2360_v6 }
  0x6a   :  { %411 = vmatmul.mubr.bf16.vlgmr.msra.gmra.mxu0 %v2105_v57  ;;  %1873 = vmatpush3.bf16.msra.mxu1 %v2123_v4  ;;  %v2144_v4 = vld [vmem:[#allocation5 + $0x230] ss:$8 sps:$4 sm:$0xff]  }
  0x6b   :  { %1958 = vmatprep.subr.bf16.mxu1 %v2360_v6  ;;  %1939 = vmatpush3.bf16.msra.mxu0 %v2124_v5  ;;  %v2145_v5 = vld [vmem:[#allocation5 + $0x220] ss:$8 sps:$4 sm:$0xff]  }
  0x6c   :  { %1940 = vmatprep.subr.bf16.mxu0 %v2360_v6  ;;  %1954 = vmatprep.mubr.msk.bf16.mxu0 %vm2361_vm0, %v2360_v6 }
  0x6f   :  { %1941 = vmatpush3.bf16.msra.mxu0 %v2125_v7  ;;  %v659_v7 = vld [vmem:[#allocation7 + $0x2] ss:$0 sm:$0xff] }
  0x70   :  { %1942 = vmatprep.subr.bf16.mxu0 %v2360_v6 }
  0x73   :  { %1943 = vmatpush3.bf16.msra.mxu0 %v2126_v8 }
  0x74   :  { %1944 = vmatprep.subr.bf16.mxu0 %v2360_v6 }
  0x77   :  { %1945 = vmatpush3.bf16.msra.mxu0 %v2127_v9 }
  0x78   :  { %1946 = vmatprep.subr.bf16.mxu0 %v2360_v6 }
  0x7b   :  { %1947 = vmatpush3.bf16.msra.mxu0 %v2128_v39  ;;  %v2161_v39 = vld [vmem:[#allocation5 + $0x2e4] ss:$8 sps:$4 sm:$0xff]  }
  0x7c   :  { %1948 = vmatprep.subr.bf16.mxu0 %v2360_v6 }
  0x7f   :  { %1949 = vmatpush3.bf16.msra.mxu0 %v2129_v40  ;;  %v2159_v40 = vld [vmem:[#allocation5 + $0x2e0] ss:$8 sps:$4 sm:$0xff]  }
  0x80   :  { %1950 = vmatprep.subr.bf16.mxu0 %v2360_v6 }
  0x83   :  { %1951 = vmatpush3.bf16.msra.mxu0 %v2130_v41  ;;  %v2164_v41 = vld [vmem:[#allocation5 + $0x2d4] ss:$8 sps:$4 sm:$0xff]  }
  0x84   :  { %1952 = vmatprep.subr.bf16.mxu0 %v2360_v6 }
  0x87   :  { %1953 = vmatpush3.bf16.msra.mxu0 %v2131_v42  ;;  %v2167_v42 = vld [vmem:[#allocation5 + $0x2c4] ss:$8 sps:$4 sm:$0xff]  }
  0x88   :  { %1978 = vmatprep.subr.bf16.mxu0 %v2360_v6 }
 0x10d   :  { %v455_v13 = vpop.f32.mrf.mxu1 }
 0x10f   :  { %v457_v17 = vpop.f32.mrf.mxu1 }
 0x111   :  { %v459_v23 = vpop.f32.mrf.mxu1 }
 0x113   :  { %v461_v31 = vpop.f32.mrf.mxu1 }
 0x12a   :  { %v412_v19 = vpop.f32.mrf.mxu0 }
 0x12b   :  { %v413_v22 = vadd.f32 %v412_v19, %v115_v18  ;;  %v2146_v19 = vld [vmem:[#allocation5 + $0x210] ss:$8 sps:$4 sm:$0xff]  }
 0x12c   :  { %v414_v20 = vpop.f32.mrf.mxu0 }
 0x12d   :  { %v415_v21 = vadd.f32 %v414_v20, %v119_v16  ;;  %v456_v30 = vadd.f32 %v455_v13, %v413_v22  ;;  %v2147_v20 = vld [vmem:[#allocation5 + $0x200] ss:$8 sps:$4 sm:$0xff]   ;;  %v2149_v22 = vld [vmem:[#allocation5 + $0x264] ss:$8 sps:$4 sm:$0xff]  }
 0x12e   :  { %v416_v24 = vpop.f32.mrf.mxu0 }
 0x12f   :  { %v417_v25 = vadd.f32 %v416_v24, %v115_v18  ;;  %v458_v27 = vadd.f32 %v457_v17, %v415_v21  ;;  %v464_v36 = vmax.f32 %v456_v30, 0.0  ;;  %v2148_v21 = vld [vmem:[#allocation5 + $0x274] ss:$8 sps:$4 sm:$0xff]   ;;  %v2151_v24 = vld [vmem:[#allocation5 + $0x244] ss:$8 sps:$4 sm:$0xff]  }
 0x130   :  { %v418_v26 = vpop.f32.mrf.mxu0 }
 0x131   :  { %v460_v28 = vadd.f32 %v459_v23, %v417_v25  ;;  %v419_v29 = vadd.f32 %v418_v26, %v119_v16  ;;  %v465_v34 = vmax.f32 %v458_v27, 0.0  ;;  %v2150_v23 = vld [vmem:[#allocation5 + $0x254] ss:$8 sps:$4 sm:$0xff]   ;;  %v768_v26 = vld [vmem:[#allocation7 + $0x3] ss:$0 sm:$0xff] }
 0x132   :  { %v2152_v25 = vld [vmem:[#allocation5 + $0x234] ss:$8 sps:$4 sm:$0xff]  }
 0x133   :  { %v462_v32 = vadd.f32 %v461_v31, %v419_v29  ;;  %v466_v33 = vmax.f32 %v460_v28, 0.0 }
 0x135   :  { %v467_v35 = vmax.f32 %v462_v32, 0.0  ;;  %v468_v38 = vpack.c.bf16 %v466_v33, %v464_v36  ;;  %v2155_v36 = vld [vmem:[#allocation5 + $0x204] ss:$8 sps:$4 sm:$0xff]  }
 0x137   :  { %v469_v37 = vpack.c.bf16 %v467_v35, %v465_v34  ;;  %v2153_v34 = vld [vmem:[#allocation5 + $0x224] ss:$8 sps:$4 sm:$0xff]   ;;  %v2154_v35 = vld [vmem:[#allocation5 + $0x214] ss:$8 sps:$4 sm:$0xff]  }
 0x139   :  { %631 = vmatprep.mubr.bf16.mxu1 %v469_v37  ;;  %v2156_v37 = vld [vmem:[#allocation5 + $0x2f0] ss:$8 sps:$4 sm:$0xff]  }
 0x13a   :  { %632 = vmatmul.mubr.bf16.vlgmr.msra.gmra.mxu1 %v468_v38  ;;  %v2158_v38 = vld [vmem:[#allocation5 + $0x2f4] ss:$8 sps:$4 sm:$0xff]  }
 0x13b   :  { %1974 = vmatprep.mubr.msk.bf16.mxu1 %vm2361_vm0, %v2360_v6  ;;  %1959 = vmatpush3.bf16.msra.mxu1 %v2132_v43  ;;  %v2165_v43 = vld [vmem:[#allocation5 + $0x2c0] ss:$8 sps:$4 sm:$0xff]  }
 0x13c   :  { %1960 = vmatprep.subr.bf16.mxu1 %v2360_v6 }
 0x13f   :  { %1961 = vmatpush3.bf16.msra.mxu1 %v2133_v44  ;;  %v2170_v44 = vld [vmem:[#allocation5 + $0x2b4] ss:$8 sps:$4 sm:$0xff]  }
 0x140   :  { %1962 = vmatprep.subr.bf16.mxu1 %v2360_v6 }
 0x143   :  { %1963 = vmatpush3.bf16.msra.mxu1 %v2134_v45  ;;  %v2173_v45 = vld [vmem:[#allocation5 + $0x2a4] ss:$8 sps:$4 sm:$0xff]  }
 0x144   :  { %1964 = vmatprep.subr.bf16.mxu1 %v2360_v6 }
 0x147   :  { %1965 = vmatpush3.bf16.msra.mxu1 %v2135_v46  ;;  %v2171_v46 = vld [vmem:[#allocation5 + $0x2a0] ss:$8 sps:$4 sm:$0xff]  }
 0x148   :  { %1966 = vmatprep.subr.bf16.mxu1 %v2360_v6 }
 0x14b   :  { %1967 = vmatpush3.bf16.msra.mxu1 %v2136_v47  ;;  %v877_v47 = vld [vmem:[#allocation7 + $0x4] ss:$0 sm:$0xff] }
 0x14c   :  { %1968 = vmatprep.subr.bf16.mxu1 %v2360_v6 }
 0x14f   :  { %1969 = vmatpush3.bf16.msra.mxu1 %v2137_v60  ;;  %v2177_v60 = vld [vmem:[#allocation5 + $0x280] ss:$8 sps:$4 sm:$0xff]  }
 0x150   :  { %1970 = vmatprep.subr.bf16.mxu1 %v2360_v6 }
 0x153   :  { %1971 = vmatpush3.bf16.msra.mxu1 %v2138_v61  ;;  %v2180_v61 = vld [vmem:[#allocation5 + $0x370] ss:$8 sps:$4 sm:$0xff]  }
 0x154   :  { %1972 = vmatprep.subr.bf16.mxu1 %v2360_v6 }
 0x157   :  { %1973 = vmatpush3.bf16.msra.mxu1 %v2139_v62  ;;  %v2182_v62 = vld [vmem:[#allocation5 + $0x374] ss:$8 sps:$4 sm:$0xff]  }
 0x158   :  { %1998 = vmatprep.subr.bf16.mxu1 %v2360_v6 }
 0x1fa   :  { %v1874_v48 = vpop.f32.mrf.mxu1 }
 0x1fc   :  { %v1875_v49 = vpop.f32.mrf.mxu1 }
 0x1fd   :  { %v1876_v50 = vadd.f32 %v1875_v49, %v1874_v48 }
 0x1fe   :  { %v1877_v52 = vpop.f32.mrf.mxu1 }
 0x1ff   :  { %v634_v54 = vadd.f32 %v1876_v50, %v502_v51 }
 0x200   :  { %v1878_v53 = vpop.f32.mrf.mxu1 }
 0x201   :  { %v1879_v55 = vadd.f32 %v1878_v53, %v1877_v52  ;;  %v640_v57 = vmax.f32 %v634_v54, 0.0 }
 0x203   :  { %v637_v56 = vadd.f32 %v1879_v55, %v502_v51 }
 0x205   :  { %v641_v58 = vmax.f32 %v637_v56, 0.0 }
 0x207   :  { %v642_v59 = vpack.c.bf16 %v641_v58, %v640_v57  ;;  %v2176_v57 = vld [vmem:[#allocation5 + $0x294] ss:$8 sps:$4 sm:$0xff]   ;;  %v2174_v58 = vld [vmem:[#allocation5 + $0x290] ss:$8 sps:$4 sm:$0xff]  }
 0x209   :  { %1955 = vmatmul.mubr.bf16.vlgmr.msra.gmra.mxu0 %v642_v59  ;;  %v2179_v59 = vld [vmem:[#allocation5 + $0x284] ss:$8 sps:$4 sm:$0xff]  }
 0x20a   :  { %1994 = vmatprep.mubr.msk.bf16.mxu0 %vm2361_vm0, %v2360_v6  ;;  %1979 = vmatpush3.bf16.msra.mxu0 %v2140_v63  ;;  %v2185_v63 = vld [vmem:[#allocation5 + $0x364] ss:$8 sps:$4 sm:$0xff]  }
 0x20b   :  { %1980 = vmatprep.subr.bf16.mxu0 %v2360_v6 }
 0x20e   :  { %1981 = vmatpush3.bf16.msra.mxu0 %v2141_v1  ;;  %v2183_v1 = vld [vmem:[#allocation5 + $0x360] ss:$8 sps:$4 sm:$0xff]  }
 0x20f   :  { %1982 = vmatprep.subr.bf16.mxu0 %v2360_v6 }
 0x212   :  { %1983 = vmatpush3.bf16.msra.mxu0 %v2142_v2  ;;  %v2188_v2 = vld [vmem:[#allocation5 + $0x354] ss:$8 sps:$4 sm:$0xff]  }
 0x213   :  { %1984 = vmatprep.subr.bf16.mxu0 %v2360_v6 }
 0x216   :  { %1985 = vmatpush3.bf16.msra.mxu0 %v2143_v3  ;;  %v2207_v3 = vld [vmem:[#allocation5 + $0x4f0] ss:$8 sps:$4 sm:$0xff]  }
 0x217   :  { %1986 = vmatprep.subr.bf16.mxu0 %v2360_v6 }
 0x21a   :  { %1987 = vmatpush3.bf16.msra.mxu0 %v2144_v4  ;;  %v2186_v4 = vld [vmem:[#allocation5 + $0x350] ss:$8 sps:$4 sm:$0xff]  }
 0x21b   :  { %1988 = vmatprep.subr.bf16.mxu0 %v2360_v6 }
 0x21e   :  { %1989 = vmatpush3.bf16.msra.mxu0 %v2145_v5  ;;  %v2191_v5 = vld [vmem:[#allocation5 + $0x344] ss:$8 sps:$4 sm:$0xff]  }
 0x21f   :  { %1990 = vmatprep.subr.bf16.mxu0 %v2360_v6 }
 0x222   :  { %1991 = vmatpush3.bf16.msra.mxu0 %v2146_v19  ;;  %v2204_v19 = vld [vmem:[#allocation5 + $0x3f0] ss:$8 sps:$4 sm:$0xff]  }
 0x223   :  { %1992 = vmatprep.subr.bf16.mxu0 %v2360_v6 }
 0x226   :  { %1993 = vmatpush3.bf16.msra.mxu0 %v2147_v20  ;;  %v2211_v20 = vld [vmem:[#allocation5 + $0x3e4] ss:$8 sps:$4 sm:$0xff]  }
 0x227   :  { %1188 = vmatprep.subr.bf16.mxu0 %v2158_v38 }
 0x2c9   :  { %v742_v8 = vpop.f32.mrf.mxu0 }
 0x2ca   :  { %v743_v10 = vadd.f32 %v742_v8, %v659_v7  ;;  %v2194_v8 = vld [vmem:[#allocation5 + $0x334] ss:$8 sps:$4 sm:$0xff]  }
 0x2cb   :  { %v1956_v9 = vpop.f32.mrf.mxu0 }
 0x2cc   :  { %v749_v16 = vmax.f32 %v743_v10, 0.0  ;;  %v2192_v9 = vld [vmem:[#allocation5 + $0x330] ss:$8 sps:$4 sm:$0xff]   ;;  %v2197_v10 = vld [vmem:[#allocation5 + $0x324] ss:$8 sps:$4 sm:$0xff]  }
 0x2cd   :  { %v745_v11 = vpop.f32.mrf.mxu0 }
 0x2ce   :  { %v746_v13 = vadd.f32 %v745_v11, %v659_v7  ;;  %v2189_v7 = vld [vmem:[#allocation5 + $0x340] ss:$8 sps:$4 sm:$0xff]  }
 0x2cf   :  { %v1957_v15 = vpop.f32.mrf.mxu0  ;;  %v2195_v11 = vld [vmem:[#allocation5 + $0x320] ss:$8 sps:$4 sm:$0xff]  }
 0x2d0   :  { %v750_v17 = vmax.f32 %v746_v13, 0.0  ;;  %v2200_v13 = vld [vmem:[#allocation5 + $0x314] ss:$8 sps:$4 sm:$0xff]   ;;  %v2198_v15 = vld [vmem:[#allocation5 + $0x310] ss:$8 sps:$4 sm:$0xff]  }
 0x2d2   :  { %v751_v18 = vpack.c.bf16 %v750_v17, %v749_v16  ;;  %v2203_v16 = vld [vmem:[#allocation5 + $0x304] ss:$8 sps:$4 sm:$0xff]   ;;  %v2201_v17 = vld [vmem:[#allocation5 + $0x300] ss:$8 sps:$4 sm:$0xff]  }
 0x2d4   :  { %1975 = vmatmul.mubr.bf16.vlgmr.msra.gmra.mxu1 %v751_v18  ;;  %v2206_v18 = vld [vmem:[#allocation5 + $0x3f4] ss:$8 sps:$4 sm:$0xff]  }
 0x2d5   :  { %2014 = vmatprep.mubr.msk.bf16.mxu1 %vm2361_vm0, %v2360_v6  ;;  %1999 = vmatpush3.bf16.msra.mxu1 %v2148_v21  ;;  %v2209_v21 = vld [vmem:[#allocation5 + $0x3e0] ss:$8 sps:$4 sm:$0xff]  }
 0x2d6   :  { %2000 = vmatprep.subr.bf16.mxu1 %v2360_v6 }
 0x2d9   :  { %2001 = vmatpush3.bf16.msra.mxu1 %v2149_v22  ;;  %v2216_v22 = vld [vmem:[#allocation5 + $0x3d4] ss:$8 sps:$4 sm:$0xff]  }
 0x2da   :  { %2002 = vmatprep.subr.bf16.mxu1 %v2360_v6 }
 0x2dd   :  { %2003 = vmatpush3.bf16.msra.mxu1 %v2150_v23  ;;  %v2214_v23 = vld [vmem:[#allocation5 + $0x3d0] ss:$8 sps:$4 sm:$0xff]  }
 0x2de   :  { %2004 = vmatprep.subr.bf16.mxu1 %v2360_v6 }
 0x2e1   :  { %2005 = vmatpush3.bf16.msra.mxu1 %v2151_v24  ;;  %v2221_v24 = vld [vmem:[#allocation5 + $0x3c4] ss:$8 sps:$4 sm:$0xff]  }
 0x2e2   :  { %2006 = vmatprep.subr.bf16.mxu1 %v2360_v6 }
 0x2e5   :  { %2007 = vmatpush3.bf16.msra.mxu1 %v2152_v25  ;;  %v2219_v25 = vld [vmem:[#allocation5 + $0x3c0] ss:$8 sps:$4 sm:$0xff]  }
 0x2e6   :  { %2008 = vmatprep.subr.bf16.mxu1 %v2360_v6 }
 0x2e9   :  { %2009 = vmatpush3.bf16.msra.mxu1 %v2153_v34 }
 0x2ea   :  { %2010 = vmatprep.subr.bf16.mxu1 %v2360_v6 }
 0x2ed   :  { %2011 = vmatpush3.bf16.msra.mxu1 %v2154_v35 }
 0x2ee   :  { %2012 = vmatprep.subr.bf16.mxu1 %v2360_v6  ;;  %v2168_v6 = vld [vmem:[#allocation5 + $0x2b0] ss:$8 sps:$4 sm:$0xff]  }
 0x2f1   :  { %2013 = vmatpush3.bf16.msra.mxu1 %v2155_v36 }
 0x2f2   :  { %1442 = vmatprep.subr.bf16.mxu1 %v2182_v62 }
 0x394   :  { %v851_v27 = vpop.f32.mrf.mxu1 }
 0x395   :  { %v852_v28 = vadd.f32 %v851_v27, %v768_v26  ;;  %v2224_v27 = vld [vmem:[#allocation5 + $0x3b0] ss:$8 sps:$4 sm:$0xff]  }
 0x396   :  { %v1976_v29 = vpop.f32.mrf.mxu1 }
 0x397   :  { %858 = vst [vmem:[#allocation8] sm:$0xff] %v852_v28 }
 0x398   :  { %v854_v30 = vpop.f32.mrf.mxu1 }
 0x399   :  { %v855_v31 = vadd.f32 %v854_v30, %v768_v26  ;;  %v2226_v26 = vld [vmem:[#allocation5 + $0x3b4] ss:$8 sps:$4 sm:$0xff]  }
 0x39a   :  { %v1977_v32 = vpop.f32.mrf.mxu1 }
 0x39b   :  { %859 = vst [vmem:[#allocation8 + $0x8] sm:$0xff] %v855_v31  ;;  %v860_v33 = vpack.c.bf16 %v855_v31, %v852_v28  ;;  %v986_v28 = vld [vmem:[#allocation7 + $0x5] ss:$0 sm:$0xff] }
 0x39d   :  { %1995 = vmatmul.mubr.bf16.vlgmr.msra.gmra.mxu0 %v860_v33 }
 0x39e   :  { %1220 = vmatprep.mubr.bf16.mxu0 %v2359_v0  ;;  %1189 = vmatpush1.bf16.msra.mxu0 %v2156_v37  ;;  %v2162_v0 = vld [vmem:[#allocation5 + $0x2d0] ss:$8 sps:$4 sm:$0xff]  }
 0x39f   :  { %1190 = vmatprep.subr.bf16.mxu0 %v2161_v39  ;;  %v2208_v37 = vld [vmem:[#allocation5 + $0x470] ss:$8 sps:$4 sm:$0xff]   ;;  %v2212_v39 = vld [vmem:[#allocation5 + $0x4e0] ss:$8 sps:$4 sm:$0xff]  }
 0x3a2   :  { %1191 = vmatpush1.bf16.msra.mxu0 %v2159_v40  ;;  %v2213_v40 = vld [vmem:[#allocation5 + $0x460] ss:$8 sps:$4 sm:$0xff]  }
 0x3a3   :  { %1192 = vmatprep.subr.bf16.mxu0 %v2164_v41  ;;  %v2217_v41 = vld [vmem:[#allocation5 + $0x4d0] ss:$8 sps:$4 sm:$0xff]  }
 0x3a6   :  { %1193 = vmatpush1.bf16.msra.mxu0 %v2162_v0  ;;  %v2218_v0 = vld [vmem:[#allocation5 + $0x450] ss:$8 sps:$4 sm:$0xff]  }
 0x3a7   :  { %1194 = vmatprep.subr.bf16.mxu0 %v2167_v42  ;;  %v2222_v42 = vld [vmem:[#allocation5 + $0x4c0] ss:$8 sps:$4 sm:$0xff]  }
 0x3aa   :  { %1195 = vmatpush1.bf16.msra.mxu0 %v2165_v43  ;;  %v2223_v43 = vld [vmem:[#allocation5 + $0x440] ss:$8 sps:$4 sm:$0xff]  }
 0x3ab   :  { %1196 = vmatprep.subr.bf16.mxu0 %v2170_v44  ;;  %v2227_v44 = vld [vmem:[#allocation5 + $0x4b0] ss:$8 sps:$4 sm:$0xff]  }
 0x3ae   :  { %1197 = vmatpush1.bf16.msra.mxu0 %v2168_v6  ;;  %v2228_v6 = vld [vmem:[#allocation5 + $0x430] ss:$8 sps:$4 sm:$0xff]  }
 0x3af   :  { %1198 = vmatprep.subr.bf16.mxu0 %v2173_v45  ;;  %v2231_v45 = vld [vmem:[#allocation5 + $0x3a4] ss:$8 sps:$4 sm:$0xff]  }
 0x3b2   :  { %1199 = vmatpush1.bf16.msra.mxu0 %v2171_v46  ;;  %v2232_v46 = vld [vmem:[#allocation5 + $0x4a0] ss:$8 sps:$4 sm:$0xff]  }
 0x3b3   :  { %1200 = vmatprep.subr.bf16.mxu0 %v2176_v57  ;;  %v1096_v57 = vld [vmem:[#allocation7 + $0x6] ss:$8 sm:$0x3] }
 0x3b6   :  { %1201 = vmatpush1.bf16.msra.mxu0 %v2174_v58 }
 0x3b7   :  { %1202 = vmatprep.subr.bf16.mxu0 %v2179_v59  ;;  %v1105_v59 = vrot.slane %v1096_v57, %v2410_v12 }
 0x3ba   :  { %1203 = vmatpush1.bf16.msra.mxu0 %v2177_v60  ;;  %v1101_v60 = vrot.slane %v1096_v57, %v2412_v14 }
 0x3bb   :  { %1916 = vmatprep.subr.bf16.mxu0 %v2207_v3 }
 0x45d   :  { %v960_v48 = vpop.f32.mrf.mxu0 }
 0x45e   :  { %v961_v50 = vadd.f32 %v960_v48, %v877_v47  ;;  %v2233_v48 = vld [vmem:[#allocation5 + $0x420] ss:$8 sps:$4 sm:$0xff]  }
 0x45f   :  { %v1996_v49 = vpop.f32.mrf.mxu0 }
 0x460   :  { %v967_v54 = vmax.f32 %v961_v50, 0.0  ;;  %v2236_v49 = vld [vmem:[#allocation5 + $0x394] ss:$8 sps:$4 sm:$0xff]   ;;  %v2237_v50 = vld [vmem:[#allocation5 + $0x490] ss:$8 sps:$4 sm:$0xff]  }
 0x461   :  { %v963_v51 = vpop.f32.mrf.mxu0 }
 0x462   :  { %v964_v52 = vadd.f32 %v963_v51, %v877_v47  ;;  %v2229_v47 = vld [vmem:[#allocation5 + $0x3a0] ss:$8 sps:$4 sm:$0xff]   ;;  %v2234_v51 = vld [vmem:[#allocation5 + $0x390] ss:$8 sps:$4 sm:$0xff]  }
 0x463   :  { %v1997_v53 = vpop.f32.mrf.mxu0 }
 0x464   :  { %v968_v55 = vmax.f32 %v964_v52, 0.0  ;;  %v2238_v52 = vld [vmem:[#allocation5 + $0x410] ss:$8 sps:$4 sm:$0xff]   ;;  %v2241_v53 = vld [vmem:[#allocation5 + $0x384] ss:$8 sps:$4 sm:$0xff]  }
 0x466   :  { %v969_v56 = vpack.c.bf16 %v968_v55, %v967_v54  ;;  %v2242_v54 = vld [vmem:[#allocation5 + $0x480] ss:$8 sps:$4 sm:$0xff]  }
 0x467   :  { %v2239_v55 = vld [vmem:[#allocation5 + $0x380] ss:$8 sps:$4 sm:$0xff]  }
 0x468   :  { %2015 = vmatmul.mubr.bf16.vlgmr.msra.gmra.mxu1 %v969_v56  ;;  %v2243_v56 = vld [vmem:[#allocation5 + $0x400] ss:$8 sps:$4 sm:$0xff]  }
 0x469   :  { %1443 = vmatpush1.bf16.msra.mxu1 %v2180_v61 }
 0x46a   :  { %1444 = vmatprep.subr.bf16.mxu1 %v2185_v63 }
 0x46d   :  { %1445 = vmatpush1.bf16.msra.mxu1 %v2183_v1 }
 0x46e   :  { %1446 = vmatprep.subr.bf16.mxu1 %v2188_v2 }
 0x471   :  { %1447 = vmatpush1.bf16.msra.mxu1 %v2186_v4 }
 0x472   :  { %1448 = vmatprep.subr.bf16.mxu1 %v2191_v5 }
 0x475   :  { %1449 = vmatpush1.bf16.msra.mxu1 %v2189_v7 }
 0x476   :  { %1450 = vmatprep.subr.bf16.mxu1 %v2194_v8 }
 0x479   :  { %1451 = vmatpush1.bf16.msra.mxu1 %v2192_v9 }
 0x47a   :  { %1452 = vmatprep.subr.bf16.mxu1 %v2197_v10 }
 0x47d   :  { %1453 = vmatpush1.bf16.msra.mxu1 %v2195_v11 }
 0x47e   :  { %1454 = vmatprep.subr.bf16.mxu1 %v2200_v13 }
 0x481   :  { %1455 = vmatpush1.bf16.msra.mxu1 %v2198_v15 }
 0x482   :  { %1456 = vmatprep.subr.bf16.mxu1 %v2203_v16 }
 0x485   :  { %1457 = vmatpush1.bf16.msra.mxu1 %v2201_v17 }
 0x486   :  { %1458 = vmatprep.subr.bf16.mxu1 %v2206_v18 }
 0x489   :  { %1459 = vmatpush2.bf16.msra.mxu1 %v2204_v19 }
 0x48a   :  { %1460 = vmatprep.subr.bf16.mxu1 %v2211_v20 }
 0x48d   :  { %1461 = vmatpush2.bf16.msra.mxu1 %v2209_v21 }
 0x48e   :  { %1462 = vmatprep.subr.bf16.mxu1 %v2216_v22 }
 0x491   :  { %1463 = vmatpush2.bf16.msra.mxu1 %v2214_v23 }
 0x492   :  { %1464 = vmatprep.subr.bf16.mxu1 %v2221_v24 }
 0x495   :  { %1465 = vmatpush2.bf16.msra.mxu1 %v2219_v25 }
 0x496   :  { %1466 = vmatprep.subr.bf16.mxu1 %v2226_v26 }
 0x499   :  { %1467 = vmatpush2.bf16.msra.mxu1 %v2224_v27 }
 0x49a   :  { %1468 = vmatprep.subr.bf16.mxu1 %v2231_v45 }
 0x49d   :  { %1469 = vmatpush2.bf16.msra.mxu1 %v2229_v47 }
 0x49e   :  { %1470 = vmatprep.subr.bf16.mxu1 %v2236_v49 }
 0x4a1   :  { %1471 = vmatpush2.bf16.msra.mxu1 %v2234_v51 }
 0x4a2   :  { %1472 = vmatprep.subr.bf16.mxu1 %v2241_v53 }
 0x4a5   :  { %1473 = vmatpush2.bf16.msra.mxu1 %v2239_v55 }
 0x528   :  { %v1069_v29 = vpop.f32.mrf.mxu1 }
 0x529   :  { %v1070_v31 = vadd.f32 %v1069_v29, %v986_v28 }
 0x52a   :  { %v2016_v30 = vpop.f32.mrf.mxu1 }
 0x52b   :  { %v1076_v35 = vmax.f32 %v1070_v31, 0.0 }
 0x52c   :  { %v1072_v32 = vpop.f32.mrf.mxu1 }
 0x52d   :  { %v1073_v33 = vadd.f32 %v1072_v32, %v986_v28 }
 0x52e   :  { %v2017_v34 = vpop.f32.mrf.mxu1 }
 0x52f   :  { %v1077_v36 = vmax.f32 %v1073_v33, 0.0 }
 0x531   :  { %v1078_v38 = vpack.c.bf16 %v1077_v36, %v1076_v35 }
 0x533   :  { %1221 = vmatmul.mubr.bf16.vlgmr.msra.gmra.mxu0 %v1078_v38 }
 0x534   :  { %1917 = vmatpush3.bf16.msra.mxu0 %v2208_v37 }
 0x535   :  { %1918 = vmatprep.subr.bf16.mxu0 %v2212_v39 }
 0x538   :  { %1919 = vmatpush3.bf16.msra.mxu0 %v2213_v40 }
 0x539   :  { %1920 = vmatprep.subr.bf16.mxu0 %v2217_v41 }
 0x53c   :  { %1921 = vmatpush3.bf16.msra.mxu0 %v2218_v0 }
 0x53d   :  { %1922 = vmatprep.subr.bf16.mxu0 %v2222_v42 }
 0x540   :  { %1923 = vmatpush3.bf16.msra.mxu0 %v2223_v43 }
 0x541   :  { %1924 = vmatprep.subr.bf16.mxu0 %v2227_v44 }
 0x544   :  { %1925 = vmatpush3.bf16.msra.mxu0 %v2228_v6 }
 0x545   :  { %1926 = vmatprep.subr.bf16.mxu0 %v2232_v46 }
 0x548   :  { %1927 = vmatpush3.bf16.msra.mxu0 %v2233_v48 }
 0x549   :  { %1928 = vmatprep.subr.bf16.mxu0 %v2237_v50 }
 0x54c   :  { %1929 = vmatpush3.bf16.msra.mxu0 %v2238_v52 }
 0x54d   :  { %1930 = vmatprep.subr.bf16.mxu0 %v2242_v54 }
 0x550   :  { %1931 = vmatpush3.bf16.msra.mxu0 %v2243_v56 }
 0x5f3   :  { %v1222_v58 = vpop.f32.mrf.mxu0 }
 0x5f4   :  { %v1223_v2 = vadd.f32 %v1222_v58, %v1101_v60 }
 0x5f5   :  { %v1224_v61 = vpop.f32.mrf.mxu0 }
 0x5f6   :  { %v1225_v63 = vadd.f32 %v1224_v61, %v1105_v59  ;;  %v1231_v9 = vmax.f32 %v1223_v2, 0.0 }
 0x5f7   :  { %v1226_v62 = vpop.f32.mrf.mxu0 }
 0x5f8   :  { %v1227_v1 = vadd.f32 %v1226_v62, %v1101_v60  ;;  %v1232_v7 = vmax.f32 %v1225_v63, 0.0 }
 0x5f9   :  { %v1228_v3 = vpop.f32.mrf.mxu0 }
 0x5fa   :  { %v1229_v4 = vadd.f32 %v1228_v3, %v1105_v59  ;;  %v1233_v5 = vmax.f32 %v1227_v1, 0.0 }
 0x5fc   :  { %v1234_v8 = vmax.f32 %v1229_v4, 0.0  ;;  %v1235_v11 = vpack.c.bf16 %v1233_v5, %v1231_v9 }
 0x5fe   :  { %v1236_v10 = vpack.c.bf16 %v1234_v8, %v1232_v7 }
 0x600   :  { %1474 = vmatprep.mubr.bf16.mxu1 %v1236_v10  ;;  %1646 = vmatprep.mubr.bf16.mxu0 %v1236_v10 }
 0x601   :  { %1475 = vmatmul.mubr.bf16.vlgmr.msra.gmra.mxu1 %v1235_v11  ;;  %1647 = vmatmul.mubr.bf16.vlgmr.msra.gmra.mxu0 %v1235_v11 }
 0x602   :  { %2315 = shalt.err (!%p2312_p5)
}
 0x603   :  { %1672 = dma.vmem_to_hbm [thread:$0]  %s1667_s2, 256, %s2467_s3, [#allocation4], %s2353_s18, %s2353_s18, %s2354_s19   ;;  %v1270_v13 = vld [vmem:[#allocation7 + $0x7] ss:$8 sm:$0x3] }
 0x604   :  { %v1275_v15 = vrot.slane %v1270_v13, %v2412_v14  ;;  %v1279_v16 = vrot.slane %v1270_v13, %v2410_v12  ;;  %v1517_v21 = vld [vmem:[#allocation7 + $0x17] ss:$0 sm:$0xff]  ;;  %s2363_s3 = smov [#allocation9]  }
 0x605   :  { %s1678_s10 = sshll.u32 %s2363_s3, 4  ;;  %s1679_s10 = int_to_ptr.vmem [resolvable:$true] %s1678_s10 }
 0x606   :  { %s2324_s11 = scalar_lea.vmem %s1679_s10, 768  ;;  %p2329_p7 = scmp.lt.s32.totalorder %s1679_s10, %s1679_s10 }
 0x607   :  { %p2325_p6 = scmp.ne.s32.totalorder %s1679_s10, %s2324_s11  ;;  %p2330_p8 = scmp.lt.s32.totalorder %s2324_s11, %s2324_s11 }
 0x609   :  { %p2331_p9 = por %p2330_p8, %p2329_p7 }
 0x60b   :  { %p2332_p10 = pnand %p2331_p9, %p2325_p6 }
 0x6c1   :  { %v1476_v17 = vpop.f32.mrf.mxu1  ;;  %v1932_v18 = vpop.f32.mrf.mxu0 }
 0x6c2   :  { %v1477_v19 = vadd.f32 %v1476_v17, %v1275_v15 }
 0x6c3   :  { %v1478_v20 = vpop.f32.mrf.mxu1  ;;  %v1933_v22 = vpop.f32.mrf.mxu0 }
 0x6c4   :  { %1655 = vst [vmem:[#allocation9] sm:$0xff] %v1477_v19  ;;  %v1479_v23 = vadd.f32 %v1478_v20, %v1279_v16  ;;  %v1934_v24 = vadd.f32 %v1933_v22, %v1932_v18 }
 0x6c5   :  { %v1480_v25 = vpop.f32.mrf.mxu1  ;;  %v1935_v26 = vpop.f32.mrf.mxu0 }
 0x6c6   :  { %1656 = vst [vmem:[#allocation9 + $0x8] sm:$0xff] %v1479_v23  ;;  %v1649_v27 = vadd.f32 %v1934_v24, %v1517_v21  ;;  %v1481_v28 = vadd.f32 %v1480_v25, %v1275_v15 }
 0x6c7   :  { %v1482_v29 = vpop.f32.mrf.mxu1  ;;  %v1936_v14 = vpop.f32.mrf.mxu0 }
 0x6c8   :  { %1659 = vst [vmem:[#allocation9 + $0x10] sm:$0xff] %v1649_v27  ;;  %1657 = vst [vmem:[#allocation9 + $0x18] sm:$0xff] %v1481_v28  ;;  %v1483_v12 = vadd.f32 %v1482_v29, %v1279_v16  ;;  %v1937_v30 = vadd.f32 %v1936_v14, %v1935_v26 }
 0x6ca   :  { %1658 = vst [vmem:[#allocation9 + $0x20] sm:$0xff] %v1483_v12  ;;  %v1652_v31 = vadd.f32 %v1937_v30, %v1517_v21 }
 0x6cc   :  { %1660 = vst [vmem:[#allocation9 + $0x28] sm:$0xff] %v1652_v31 }
 0x6cd   :  { %2335 = shalt.err (!%p2332_p10)
}
 0x6ce   :  { %s2364_s12 = smov 384   ;;  %s2365_s13 = smov 24  }
 0x6cf   :  { %1684 = dma.vmem_to_hbm [thread:$0]  %s1679_s10, 768, %s2468_s4, [#allocation10], %s2364_s12, %s2364_s12, %s2365_s13  }
 0x6d0   :  { %2348 = dma.done.wait [#allocation4], 256  }
 0x6d1   :  { %2349 = vsyncadd [#allocation4], 4294967040 }
 0x6d2   :  { %2350 = dma.done.wait [#allocation10], 768  }
 0x6d3   :  { %2351 = vsyncadd [#allocation10], 4294966528 }
 0x6d4   :  { %1691 = vsyncpa [#allocation3], 1 }
 0x6d5   :  { %1692 = vsyncpa [#allocation6], 1 }
 0x6d6   :  { %1693 = vsyncpa [#allocation4], 1 }
 0x6d7   :  { %1694 = vsyncpa [#allocation10], 1 }

</bundles_post_ra>
